<compile_context>
chip_gen: v5e
topology: v5e:2x2
jax: 0.10.0
libtpu: 0.0.40
codegen_flags: <defaults>
</compile_context>

<pallas_src>
import functools

import jax
import jax.numpy as jnp
from jax.experimental import pallas as pl
from jax.experimental.pallas import tpu as pltpu

EPS = 1e-5  # nn.BatchNorm1d default eps


def _round_up(a: int, b: int) -> int:
    return ((a + b - 1) // b) * b


def _gemm_bias_kernel(x_ref, w_ref, b_ref, o_ref, acc_ref):
    # x_ref: (tm, tk)  w_ref: (tk, tn)  b_ref: (1, tn)  o_ref: (tm, tn)
    k = pl.program_id(2)

    @pl.when(k == 0)
    def _():
        acc_ref[...] = jnp.zeros_like(acc_ref)

    acc_ref[...] += jnp.dot(x_ref[...], w_ref[...],
                            preferred_element_type=jnp.float32)

    @pl.when(k == pl.num_programs(2) - 1)
    def _():
        o_ref[...] = (acc_ref[...]
                      + b_ref[...].astype(jnp.float32)).astype(o_ref.dtype)


@functools.partial(jax.jit, static_argnames=("tm", "tn", "tk", "compute_dtype"))
def linear_bn_forward(x, gamma, beta, weight, bias, *,
                      tm=256, tn=256, tk=512, compute_dtype=None):
    """x: (N, F); gamma/beta: (F,); weight: (O, F); bias: (O,) -> (N, O)."""
    n, f = x.shape
    o = weight.shape[0]

    # ---- BatchNorm1d training-mode batch statistics (f32, biased variance) ----
    xf = x.astype(jnp.float32)
    mean = jnp.mean(xf, axis=0)                       # (F,)
    var = jnp.mean(jnp.square(xf - mean), axis=0)     # (F,) biased (matches fwd)
    s = gamma.astype(jnp.float32) * jax.lax.rsqrt(var + EPS)

    # ---- Fold BN into the linear layer (single fused XLA prologue) ----
    w32 = weight.astype(jnp.float32)                  # (O, F)
    w_folded = (w32 * s[None, :]).T                   # (F, O) == W^T * s[:, None]
    b_folded = (bias.astype(jnp.float32)
                + (beta.astype(jnp.float32) - mean * s) @ w32.T)   # (O,)

    # ---- MXU operand dtype: keep bf16 if input is bf16, else f32 ----
    if compute_dtype is None:
        cd = jnp.bfloat16 if x.dtype == jnp.bfloat16 else jnp.float32
    else:
        cd = jnp.dtype(compute_dtype)

    # ---- Pad to MXU / lane-aligned tile multiples ----
    tm = min(tm, _round_up(n, 8))
    tk = min(tk, _round_up(f, 128))
    tn = min(tn, _round_up(o, 128))
    n_p, f_p, o_p = _round_up(n, tm), _round_up(f, tk), _round_up(o, tn)

    x_p = jnp.pad(x.astype(cd), ((0, n_p - n), (0, f_p - f)))
    w_p = jnp.pad(w_folded.astype(cd), ((0, f_p - f), (0, o_p - o)))
    b_p = jnp.pad(b_folded, (0, o_p - o)).reshape(1, o_p)

    grid = (n_p // tm, o_p // tn, f_p // tk)

    item = jnp.dtype(cd).itemsize
    out_item = jnp.dtype(x.dtype).itemsize
    cost = pl.CostEstimate(
        flops=2 * n_p * f_p * o_p,
        transcendentals=0,
        bytes_accessed=(n_p * f_p + f_p * o_p + o_p) * item + n_p * o_p * out_item)

    # Double-buffered input tiles + output tile + f32 accumulator (v7x: 64 MiB).
    vmem_need = (2 * (tm * tk + tk * tn + tn) * item
                 + 2 * tm * tn * out_item
                 + tm * tn * 4)
    vmem_limit = int(min(max(2 * vmem_need, 4 << 20), 48 << 20))

    out_p = pl.pallas_call(
        _gemm_bias_kernel,
        out_shape=jax.ShapeDtypeStruct((n_p, o_p), x.dtype),
        grid_spec=pltpu.PrefetchScalarGridSpec(
            num_scalar_prefetch=0,
            grid=grid,
            in_specs=[
                pl.BlockSpec((tm, tk), lambda i, j, k: (i, k)),
                pl.BlockSpec((tk, tn), lambda i, j, k: (k, j)),
                pl.BlockSpec((1, tn), lambda i, j, k: (0, j)),
            ],
            out_specs=pl.BlockSpec((tm, tn), lambda i, j, k: (i, j)),
            scratch_shapes=[pltpu.VMEM((tm, tn), jnp.float32)],
        ),
        compiler_params=pltpu.CompilerParams(
            dimension_semantics=("parallel", "parallel", "arbitrary"),
            vmem_limit_bytes=vmem_limit),
        cost_estimate=cost,
    )(x_p, w_p, b_p)

    # TODO(synk): PyTorch train-mode BatchNorm1d also updates running_mean /
    # running_var (unbiased) as a module side effect; forward output only here.
    return out_p[:n, :o]


if __name__ == "__main__":
    in_features = 5
    out_features = 1
    batch = 8

    key = jax.random.PRNGKey(0)
    kx, kw, kb = jax.random.split(key, 3)

    # Example input
    x = jax.random.normal(kx, (batch, in_features), dtype=jnp.float32)

    # Deterministic parameter init (mirrors PyTorch defaults):
    # BatchNorm1d: weight = 1, bias = 0
    gamma = jnp.ones((in_features,), dtype=jnp.float32)
    beta = jnp.zeros((in_features,), dtype=jnp.float32)
    # Linear: uniform(-1/sqrt(F), 1/sqrt(F)) for weight and bias
    bound = 1.0 / jnp.sqrt(jnp.float32(in_features))
    weight = jax.random.uniform(
        kw, (out_features, in_features), dtype=jnp.float32,
        minval=-bound, maxval=bound)
    bias = jax.random.uniform(
        kb, (out_features,), dtype=jnp.float32, minval=-bound, maxval=bound)

    out = linear_bn_forward(x, gamma, beta, weight, bias)
    jax.block_until_ready(out)

    # Pure-JAX reference (PyTorch semantics: train-mode BN then Linear)
    mean = jnp.mean(x, axis=0, keepdims=True)
    var = jnp.mean((x - mean) ** 2, axis=0, keepdims=True)
    y_ref = (x - mean) / jnp.sqrt(var + EPS) * gamma + beta
    ref = y_ref @ weight.T + bias
    assert jnp.allclose(out, ref, atol=2e-5, rtol=2e-5), (out, ref)

    print("KERNEL_OK")
</pallas_src>

<mosaic_0001>
module attributes {stable_mosaic.version = 11 : i64} {
  func.func @_gemm_bias_kernel(%arg0: i32, %arg1: i32, %arg2: i32, %arg3: memref<8x128xf32, #tpu.memory_space<vmem>>, %arg4: memref<128x128xf32, #tpu.memory_space<vmem>>, %arg5: memref<1x128xf32, #tpu.memory_space<vmem>>, %arg6: memref<8x128xf32, #tpu.memory_space<vmem>>, %arg7: memref<8x128xf32, #tpu.memory_space<vmem>>) attributes {dimension_semantics = [#tpu.dimension_semantics<parallel>, #tpu.dimension_semantics<parallel>, #tpu.dimension_semantics<arbitrary>], iteration_bounds = array<i64: 1, 1, 1>, scalar_prefetch = 0 : i64, scratch_operands = 1 : i64, tpu.core_type = #tpu.core_type<tc>, window_params = [{transform_indices = @transform_0, window_bounds = array<i64: 8, 128>}, {transform_indices = @transform_1, window_bounds = array<i64: 128, 128>}, {transform_indices = @transform_2, window_bounds = array<i64: 1, 128>}, {transform_indices = @transform_3, window_bounds = array<i64: 8, 128>}]} {
    %c0_i32 = arith.constant 0 : i32
    %0 = arith.cmpi eq, %arg2, %c0_i32 : i32
    %1 = arith.extui %0 : i1 to i32
    %c0_i32_0 = arith.constant 0 : i32
    %2 = arith.cmpi ne, %1, %c0_i32_0 : i32
    scf.if %2 {
      %cst_10 = arith.constant 0.000000e+00 : f32
      %12 = vector.broadcast %cst_10 : f32 to vector<8x128xf32>
      %c0_11 = arith.constant 0 : index
      %c0_12 = arith.constant 0 : index
      %13 = vector.load %arg7[%c0_11, %c0_12] : memref<8x128xf32, #tpu.memory_space<vmem>>, vector<8x128xf32>
      tpu.vector_store %arg7[%c0_11, %c0_12], %12 {strides = array<i32>} : memref<8x128xf32, #tpu.memory_space<vmem>>, vector<8x128xf32>,
    } else {
    }
    %c0 = arith.constant 0 : index
    %c0_1 = arith.constant 0 : index
    %3 = vector.load %arg7[%c0, %c0_1] : memref<8x128xf32, #tpu.memory_space<vmem>>, vector<8x128xf32>
    %c0_2 = arith.constant 0 : index
    %c0_3 = arith.constant 0 : index
    %4 = vector.load %arg3[%c0_2, %c0_3] : memref<8x128xf32, #tpu.memory_space<vmem>>, vector<8x128xf32>
    %c0_4 = arith.constant 0 : index
    %c0_5 = arith.constant 0 : index
    %5 = vector.load %arg4[%c0_4, %c0_5] : memref<128x128xf32, #tpu.memory_space<vmem>>, vector<128x128xf32>
    %cst = arith.constant dense<0.000000e+00> : vector<8x128xf32>
    %6 = tpu.matmul %4, %5, %cst {dimension_numbers = #tpu.dot_dimension_numbers<[1], [0], [0], [1], [0, 0, 1, 1], [], []>} : vector<8x128xf32>, vector<128x128xf32>, vector<8x128xf32> -> vector<8x128xf32>
    %7 = arith.addf %3, %6 : vector<8x128xf32>
    %c0_6 = arith.constant 0 : index
    %c0_7 = arith.constant 0 : index
    %8 = vector.load %arg7[%c0_6, %c0_7] : memref<8x128xf32, #tpu.memory_space<vmem>>, vector<8x128xf32>
    tpu.vector_store %arg7[%c0_6, %c0_7], %7 {strides = array<i32>} : memref<8x128xf32, #tpu.memory_space<vmem>>, vector<8x128xf32>,
    %c0_i32_8 = arith.constant 0 : i32
    %9 = arith.cmpi eq, %arg2, %c0_i32_8 : i32
    %10 = arith.extui %9 : i1 to i32
    %c0_i32_9 = arith.constant 0 : i32
    %11 = arith.cmpi ne, %10, %c0_i32_9 : i32
    scf.if %11 {
      %c0_10 = arith.constant 0 : index
      %c0_11 = arith.constant 0 : index
      %12 = vector.load %arg7[%c0_10, %c0_11] : memref<8x128xf32, #tpu.memory_space<vmem>>, vector<8x128xf32>
      %c0_12 = arith.constant 0 : index
      %c0_13 = arith.constant 0 : index
      %13 = vector.load %arg5[%c0_12, %c0_13] : memref<1x128xf32, #tpu.memory_space<vmem>>, vector<1x128xf32>
      %14 = vector.broadcast %13 : vector<1x128xf32> to vector<8x128xf32>
      %15 = arith.addf %12, %14 : vector<8x128xf32>
      %c0_14 = arith.constant 0 : index
      %c0_15 = arith.constant 0 : index
      %16 = vector.load %arg6[%c0_14, %c0_15] : memref<8x128xf32, #tpu.memory_space<vmem>>, vector<8x128xf32>
      tpu.vector_store %arg6[%c0_14, %c0_15], %15 {strides = array<i32>} : memref<8x128xf32, #tpu.memory_space<vmem>>, vector<8x128xf32>,
    } else {
    }
    return
  }
  func.func @transform_0(%arg0: i32, %arg1: i32, %arg2: i32) -> (i32, i32) {
    %c0_i32 = arith.constant 0 : i32
    return %arg0, %arg2 : i32, i32
  }
  func.func @transform_1(%arg0: i32, %arg1: i32, %arg2: i32) -> (i32, i32) {
    %c0_i32 = arith.constant 0 : i32
    return %arg2, %arg1 : i32, i32
  }
  func.func @transform_2(%arg0: i32, %arg1: i32, %arg2: i32) -> (i32, i32) {
    %c0_i32 = arith.constant 0 : i32
    %c0_i32_0 = arith.constant 0 : i32
    return %c0_i32, %arg1 : i32, i32
  }
  func.func @transform_3(%arg0: i32, %arg1: i32, %arg2: i32) -> (i32, i32) {
    %c0_i32 = arith.constant 0 : i32
    return %arg0, %arg1 : i32, i32
  }
}

</mosaic_0001>

<bundles_post_ra>
// kernel: linear_bn_forward.1
= control target key start
LH: loop header
LB: loop body
LE: loop exit
PB: predicated region body
PF: predicated region fallthrough
CT: control target
= control target key end

     0   :  { %s151_s1 = inlined_call_operand.vmem [shape: f32[128,128], index: 1, kind: input, shape index: {}]   ;;  %s152_s2 = inlined_call_operand.vmem [shape: f32[1,128], index: 2, kind: input, shape index: {}]   ;;  %s153_s0 = inlined_call_operand.vmem [shape: f32[8,128], index: 0, kind: input, shape index: {}]   ;;  %s154_s3 = inlined_call_operand.vmem [shape: f32[8,128], index: 3, kind: output, shape index: {}]  }
   0x1   :  { %v36_v0 = vld [vmem:[%s151_s1 + $0x78] sm:$0xff]  ;;  %v35_v1 = vld [vmem:[%s151_s1 + $0x70] sm:$0xff]  ;;  %v34_v2 = vld [vmem:[%s151_s1 + $0x68] sm:$0xff] }
   0x2   :  { %37 = vmatpush.msra.mxu0 %v36_v0  ;;  %v33_v3 = vld [vmem:[%s151_s1 + $0x60] sm:$0xff]  ;;  %v32_v4 = vld [vmem:[%s151_s1 + $0x58] sm:$0xff]  ;;  %v31_v5 = vld [vmem:[%s151_s1 + $0x50] sm:$0xff] }
   0x3   :  { %v30_v6 = vld [vmem:[%s151_s1 + $0x48] sm:$0xff]  ;;  %v29_v7 = vld [vmem:[%s151_s1 + $0x40] sm:$0xff]  ;;  %v28_v8 = vld [vmem:[%s151_s1 + $0x38] sm:$0xff] }
   0x4   :  { %38 = vmatpush.msra.mxu0 %v35_v1  ;;  %v27_v9 = vld [vmem:[%s151_s1 + $0x30] sm:$0xff]  ;;  %v26_v10 = vld [vmem:[%s151_s1 + $0x28] sm:$0xff]  ;;  %v25_v11 = vld [vmem:[%s151_s1 + $0x20] sm:$0xff] }
   0x5   :  { %v24_v12 = vld [vmem:[%s151_s1 + $0x18] sm:$0xff]  ;;  %v23_v13 = vld [vmem:[%s151_s1 + $0x10] sm:$0xff]  ;;  %v22_v14 = vld [vmem:[%s151_s1 + $0x8] sm:$0xff] }
   0x6   :  { %39 = vmatpush.msra.mxu0 %v34_v2  ;;  %v21_v15 = vld [vmem:[%s151_s1] sm:$0xff] }
   0x7   :  { %v20_v16 = vld [vmem:[%s153_s0] sm:$0xff] }
   0x8   :  { %40 = vmatpush.msra.mxu0 %v33_v3  ;;  %v73_v17 = vld [vmem:[%s152_s2] ss:$0 sm:$0xff] }
   0xa   :  { %41 = vmatpush.msra.mxu0 %v32_v4 }
   0xc   :  { %42 = vmatpush.msra.mxu0 %v31_v5 }
   0xe   :  { %43 = vmatpush.msra.mxu0 %v30_v6 }
  0x10   :  { %44 = vmatpush.msra.mxu0 %v29_v7 }
  0x12   :  { %45 = vmatpush.msra.mxu0 %v28_v8 }
  0x14   :  { %46 = vmatpush.msra.mxu0 %v27_v9 }
  0x16   :  { %47 = vmatpush.msra.mxu0 %v26_v10 }
  0x18   :  { %48 = vmatpush.msra.mxu0 %v25_v11 }
  0x1a   :  { %49 = vmatpush.msra.mxu0 %v24_v12 }
  0x1c   :  { %50 = vmatpush.msra.mxu0 %v23_v13 }
  0x1e   :  { %51 = vmatpush.msra.mxu0 %v22_v14 }
  0x20   :  { %52 = vmatpush.msra.mxu0 %v21_v15 }
  0x21   :  { %53 = vmatmul.f32.vlgmr.msra.gmra.mxu0 %v20_v16 }
  0x9e   :  { %v54_v18 = vpop.f32.mrf.mxu0 }
  0x9f   :  { %v67_v19 = vadd.f32 %v73_v17, %v54_v18 }
  0xa1   :  { %68 = vst [vmem:[%s154_s3] sm:$0xff] %v67_v19 }

</bundles_post_ra>
